<compile_context>
chip_gen: v7x
topology: tpu7x:2x2x1
jax: 0.10.0
libtpu: 0.0.40
codegen_flags: <defaults>
</compile_context>

<pallas_src>
import jax
import jax.numpy as jnp
from jax import lax
from jax.experimental import pallas as pl
from jax.experimental.pallas import tpu as pltpu


def _round_up(n, m):
    return ((n + m - 1) // m) * m


def _fcnet_kernel(x_ref, w1_ref, b1_ref, w2a_ref, b2a_ref, w2b_ref, b2b_ref,
                  w3_ref, b3_ref, out_ref):
    # x_ref: (TB, D) f32, native batch-major layout (no wrapper transpose).
    xb = x_ref[...].astype(jnp.bfloat16)

    # lin1 + ReLU: NT contraction (D, D) x (TB, D) -> (D, TB); from here on
    # batch lives on lanes (lane-dense) and features on sublanes.
    nt = (((1,), (1,)), ((), ()))
    h = lax.dot_general(w1_ref[...], xb, nt, preferred_element_type=jnp.float32)
    h = jnp.maximum(h + b1_ref[...], 0.0).astype(jnp.bfloat16)        # (D, TB)

    # lin2 = Linear(D, 64) -> ReLU -> Linear(64, D)
    h = jnp.dot(w2a_ref[...], h, preferred_element_type=jnp.float32)
    h = jnp.maximum(h + b2a_ref[...], 0.0).astype(jnp.bfloat16)       # (64, TB)
    h = jnp.dot(w2b_ref[...], h, preferred_element_type=jnp.float32)

    # outer ReLU (self.sig)
    h = jnp.maximum(h + b2b_ref[...], 0.0).astype(jnp.bfloat16)       # (D, TB)

    # lin3: (OUT, D) @ (D, TB) -> (OUT, TB) f32 — unmasked full-lane store.
    out_ref[...] = (
        jnp.dot(w3_ref[...], h, preferred_element_type=jnp.float32) + b3_ref[...]
    )


def baseline_fcnet_forward(x, params, *, is_value=False, max_tile=8192):
    """x: (B, D) float32.  params in PyTorch layout: W (out, in), b (out, 1).
    Returns the flat (B*out,) vector (like .view(-1)), softmaxed over the whole
    vector unless is_value."""
    w1, b1, w2a, b2a, w2b, b2b, w3, b3 = params
    B, D = x.shape
    out_dim = w3.shape[0]

    # bf16 matmul operands (tiny weights, cast once); biases stay f32.
    w1b = w1.astype(jnp.bfloat16)
    w2ab = w2a.astype(jnp.bfloat16)
    w2bb = w2b.astype(jnp.bfloat16)
    w3b = w3.astype(jnp.bfloat16)

    # Batch tiling: lane-aligned (multiple of 128), large tiles to amortize the
    # ~0.35 us/step pipeline overhead, and >= 2 tiles once B is big enough so
    # the "parallel" axis can shard across v7x's two TensorCores.
    LANE = 128
    B_up = _round_up(B, LANE)
    if B_up <= LANE:
        TB = LANE
    else:
        TB = min(max_tile, _round_up((B_up + 1) // 2, LANE))
    num_tiles = pl.cdiv(B_up, TB)
    B_pad = num_tiles * TB

    # Only tiny batches get an explicit pad (so the single block is in-bounds);
    # larger batches stream x as-is (no extra HBM pass) and Pallas handles the
    # ragged last block (garbage columns are independent and sliced off below).
    x_in = jnp.pad(x, ((0, LANE - B), (0, 0))) if B < LANE else x

    const = lambda i: (0, 0)
    grid_spec = pltpu.PrefetchScalarGridSpec(
        num_scalar_prefetch=0,
        grid=(num_tiles,),
        in_specs=[
            pl.BlockSpec((TB, D), lambda i: (i, 0)),   # x streamed per tile
            pl.BlockSpec(w1b.shape, const),            # weights: VMEM-resident
            pl.BlockSpec(b1.shape, const),
            pl.BlockSpec(w2ab.shape, const),
            pl.BlockSpec(b2a.shape, const),
            pl.BlockSpec(w2bb.shape, const),
            pl.BlockSpec(b2b.shape, const),
            pl.BlockSpec(w3b.shape, const),
            pl.BlockSpec(b3.shape, const),
        ],
        out_specs=pl.BlockSpec((out_dim, TB), lambda i: (0, i)),
    )

    out_t = pl.pallas_call(
        _fcnet_kernel,
        out_shape=jax.ShapeDtypeStruct((out_dim, B_pad), jnp.float32),
        grid_spec=grid_spec,
        compiler_params=pltpu.CompilerParams(
            dimension_semantics=("parallel",)),
    )(x_in, w1b, b1, w2ab, b2a, w2bb, b2b, w3b, b3)

    # Drop batch padding; restore PyTorch (B, out).view(-1) row-major order.
    logits = out_t[:, :B].T.reshape(-1)

    if is_value:
        return logits
    # Softmax(dim=0) over the entire flattened vector (global across batch).
    return jax.nn.softmax(logits, axis=0)


def _init_linear(key, fan_in, fan_out):
    """PyTorch-default-style uniform(-1/sqrt(fan_in), ...), W in (out, in) layout."""
    kw, kb = jax.random.split(key)
    bound = 1.0 / jnp.sqrt(jnp.float32(fan_in))
    w = jax.random.uniform(kw, (fan_out, fan_in), jnp.float32, -bound, bound)
    b = jax.random.uniform(kb, (fan_out, 1), jnp.float32, -bound, bound)
    return w, b


def make_params(key, input_dim=8, output_dim=2, hidden=64):
    k1, k2a, k2b, k3 = jax.random.split(key, 4)
    w1, b1 = _init_linear(k1, input_dim, input_dim)
    w2a, b2a = _init_linear(k2a, input_dim, hidden)
    w2b, b2b = _init_linear(k2b, hidden, input_dim)
    w3, b3 = _init_linear(k3, input_dim, output_dim)
    return (w1, b1, w2a, b2a, w2b, b2b, w3, b3)


def _reference(x, params, *, is_value=False):
    """Pure-JAX f32 reference of the same forward (PyTorch-layout params)."""
    w1, b1, w2a, b2a, w2b, b2b, w3, b3 = params
    h = jnp.maximum(x @ w1.T + b1.T, 0.0)
    h = jnp.maximum(h @ w2a.T + b2a.T, 0.0)
    h = h @ w2b.T + b2b.T
    h = jnp.maximum(h, 0.0)
    logits = (h @ w3.T + b3.T).reshape(-1)
    if is_value:
        return logits
    return jax.nn.softmax(logits, axis=0)


if __name__ == "__main__":
    key = jax.random.PRNGKey(0)
    kx, kp, kx2 = jax.random.split(key, 3)

    B, D, OUT = 2, 8, 2
    x = jax.random.normal(kx, (B, D), jnp.float32)
    params = make_params(kp, input_dim=D, output_dim=OUT)

    # bf16 matmul operands with f32 accumulation -> loosened tolerances.
    TOL = dict(atol=5e-2, rtol=5e-2)

    # policy head (softmax over flattened logits)
    out_policy = jax.block_until_ready(
        baseline_fcnet_forward(x, params, is_value=False))
    # value head (raw flattened logits)
    out_value = jax.block_until_ready(
        baseline_fcnet_forward(x, params, is_value=True))

    ref_policy = _reference(x, params, is_value=False)
    ref_value = _reference(x, params, is_value=True)

    assert out_policy.shape == (B * OUT,)
    assert out_value.shape == (B * OUT,)
    assert jnp.allclose(out_policy, ref_policy, **TOL)
    assert jnp.allclose(out_value, ref_value, **TOL)

    # Larger batch exercises the multi-tile path: grid=(2,), TB=512, parallel axis.
    B2 = 1024
    x2 = jax.random.normal(kx2, (B2, D), jnp.float32)
    out2 = jax.block_until_ready(
        baseline_fcnet_forward(x2, params, is_value=True))
    ref2 = _reference(x2, params, is_value=True)
    assert out2.shape == (B2 * OUT,)
    assert jnp.allclose(out2, ref2, **TOL)

    print("KERNEL_OK")
</pallas_src>

<mosaic_0001>
module attributes {stable_mosaic.version = 11 : i64} {
  func.func @_fcnet_kernel(%arg0: i32, %arg1: memref<128x8xf32, #tpu.memory_space<vmem>>, %arg2: memref<8x8xbf16, #tpu.memory_space<vmem>>, %arg3: memref<8x1xf32, #tpu.memory_space<vmem>>, %arg4: memref<64x8xbf16, #tpu.memory_space<vmem>>, %arg5: memref<64x1xf32, #tpu.memory_space<vmem>>, %arg6: memref<8x64xbf16, #tpu.memory_space<vmem>>, %arg7: memref<8x1xf32, #tpu.memory_space<vmem>>, %arg8: memref<2x8xbf16, #tpu.memory_space<vmem>>, %arg9: memref<2x1xf32, #tpu.memory_space<vmem>>, %arg10: memref<2x128xf32, #tpu.memory_space<vmem>>) attributes {dimension_semantics = [#tpu.dimension_semantics<parallel>], iteration_bounds = array<i64: 1>, scalar_prefetch = 0 : i64, scratch_operands = 0 : i64, tpu.core_type = #tpu.core_type<tc>, window_params = [{transform_indices = @transform_0, window_bounds = array<i64: 128, 8>}, {pipeline_mode = #tpu.pipeline_mode<synchronous>, transform_indices = @transform_1, window_bounds = array<i64: 8, 8>}, {pipeline_mode = #tpu.pipeline_mode<synchronous>, transform_indices = @transform_2, window_bounds = array<i64: 8, 1>}, {pipeline_mode = #tpu.pipeline_mode<synchronous>, transform_indices = @transform_3, window_bounds = array<i64: 64, 8>}, {pipeline_mode = #tpu.pipeline_mode<synchronous>, transform_indices = @transform_4, window_bounds = array<i64: 64, 1>}, {pipeline_mode = #tpu.pipeline_mode<synchronous>, transform_indices = @transform_5, window_bounds = array<i64: 8, 64>}, {pipeline_mode = #tpu.pipeline_mode<synchronous>, transform_indices = @transform_6, window_bounds = array<i64: 8, 1>}, {pipeline_mode = #tpu.pipeline_mode<synchronous>, transform_indices = @transform_7, window_bounds = array<i64: 2, 8>}, {pipeline_mode = #tpu.pipeline_mode<synchronous>, transform_indices = @transform_8, window_bounds = array<i64: 2, 1>}, {transform_indices = @transform_9, window_bounds = array<i64: 2, 128>}]} {
    %c0 = arith.constant 0 : index
    %c0_0 = arith.constant 0 : index
    %0 = vector.load %arg1[%c0, %c0_0] : memref<128x8xf32, #tpu.memory_space<vmem>>, vector<128x8xf32>
    %1 = arith.truncf %0 : vector<128x8xf32> to vector<128x8xbf16>
    %c0_1 = arith.constant 0 : index
    %c0_2 = arith.constant 0 : index
    %2 = vector.load %arg2[%c0_1, %c0_2] : memref<8x8xbf16, #tpu.memory_space<vmem>>, vector<8x8xbf16>
    %cst = arith.constant dense<0.000000e+00> : vector<8x128xf32>
    %3 = tpu.matmul %2, %1, %cst {dimension_numbers = #tpu.dot_dimension_numbers<[1], [1], [0], [0], [0, 0, 1, 0], [], []>} : vector<8x8xbf16>, vector<128x8xbf16>, vector<8x128xf32> -> vector<8x128xf32>
    %c0_3 = arith.constant 0 : index
    %c0_4 = arith.constant 0 : index
    %4 = vector.load %arg3[%c0_3, %c0_4] : memref<8x1xf32, #tpu.memory_space<vmem>>, vector<8x1xf32>
    %5 = vector.broadcast %4 : vector<8x1xf32> to vector<8x128xf32>
    %6 = arith.addf %3, %5 : vector<8x128xf32>
    %cst_5 = arith.constant 0.000000e+00 : f32
    %7 = vector.broadcast %cst_5 : f32 to vector<8x128xf32>
    %8 = arith.maximumf %6, %7 : vector<8x128xf32>
    %9 = arith.truncf %8 : vector<8x128xf32> to vector<8x128xbf16>
    %c0_6 = arith.constant 0 : index
    %c0_7 = arith.constant 0 : index
    %10 = vector.load %arg4[%c0_6, %c0_7] : memref<64x8xbf16, #tpu.memory_space<vmem>>, vector<64x8xbf16>
    %cst_8 = arith.constant dense<0.000000e+00> : vector<64x128xf32>
    %11 = tpu.matmul %10, %9, %cst_8 {dimension_numbers = #tpu.dot_dimension_numbers<[1], [0], [0], [1], [0, 0, 1, 1], [], []>} : vector<64x8xbf16>, vector<8x128xbf16>, vector<64x128xf32> -> vector<64x128xf32>
    %c0_9 = arith.constant 0 : index
    %c0_10 = arith.constant 0 : index
    %12 = vector.load %arg5[%c0_9, %c0_10] : memref<64x1xf32, #tpu.memory_space<vmem>>, vector<64x1xf32>
    %13 = vector.broadcast %12 : vector<64x1xf32> to vector<64x128xf32>
    %14 = arith.addf %11, %13 : vector<64x128xf32>
    %cst_11 = arith.constant 0.000000e+00 : f32
    %15 = vector.broadcast %cst_11 : f32 to vector<64x128xf32>
    %16 = arith.maximumf %14, %15 : vector<64x128xf32>
    %17 = arith.truncf %16 : vector<64x128xf32> to vector<64x128xbf16>
    %c0_12 = arith.constant 0 : index
    %c0_13 = arith.constant 0 : index
    %18 = vector.load %arg6[%c0_12, %c0_13] : memref<8x64xbf16, #tpu.memory_space<vmem>>, vector<8x64xbf16>
    %cst_14 = arith.constant dense<0.000000e+00> : vector<8x128xf32>
    %19 = tpu.matmul %18, %17, %cst_14 {dimension_numbers = #tpu.dot_dimension_numbers<[1], [0], [0], [1], [0, 0, 1, 1], [], []>} : vector<8x64xbf16>, vector<64x128xbf16>, vector<8x128xf32> -> vector<8x128xf32>
    %c0_15 = arith.constant 0 : index
    %c0_16 = arith.constant 0 : index
    %20 = vector.load %arg7[%c0_15, %c0_16] : memref<8x1xf32, #tpu.memory_space<vmem>>, vector<8x1xf32>
    %21 = vector.broadcast %20 : vector<8x1xf32> to vector<8x128xf32>
    %22 = arith.addf %19, %21 : vector<8x128xf32>
    %cst_17 = arith.constant 0.000000e+00 : f32
    %23 = vector.broadcast %cst_17 : f32 to vector<8x128xf32>
    %24 = arith.maximumf %22, %23 : vector<8x128xf32>
    %25 = arith.truncf %24 : vector<8x128xf32> to vector<8x128xbf16>
    %c0_18 = arith.constant 0 : index
    %c0_19 = arith.constant 0 : index
    %26 = vector.load %arg8[%c0_18, %c0_19] : memref<2x8xbf16, #tpu.memory_space<vmem>>, vector<2x8xbf16>
    %cst_20 = arith.constant dense<0.000000e+00> : vector<2x128xf32>
    %27 = tpu.matmul %26, %25, %cst_20 {dimension_numbers = #tpu.dot_dimension_numbers<[1], [0], [0], [1], [0, 0, 1, 1], [], []>} : vector<2x8xbf16>, vector<8x128xbf16>, vector<2x128xf32> -> vector<2x128xf32>
    %c0_21 = arith.constant 0 : index
    %c0_22 = arith.constant 0 : index
    %28 = vector.load %arg9[%c0_21, %c0_22] : memref<2x1xf32, #tpu.memory_space<vmem>>, vector<2x1xf32>
    %29 = vector.broadcast %28 : vector<2x1xf32> to vector<2x128xf32>
    %30 = arith.addf %27, %29 : vector<2x128xf32>
    %c0_23 = arith.constant 0 : index
    %c0_24 = arith.constant 0 : index
    %31 = vector.load %arg10[%c0_23, %c0_24] : memref<2x128xf32, #tpu.memory_space<vmem>>, vector<2x128xf32>
    tpu.vector_store %arg10[%c0_23, %c0_24], %30 {strides = array<i32>} : memref<2x128xf32, #tpu.memory_space<vmem>>, vector<2x128xf32>,
    return
  }
  func.func @transform_0(%arg0: i32) -> (i32, i32) {
    %c0_i32 = arith.constant 0 : i32
    %c0_i32_0 = arith.constant 0 : i32
    return %arg0, %c0_i32 : i32, i32
  }
  func.func @transform_1(%arg0: i32) -> (i32, i32) {
    %c0_i32 = arith.constant 0 : i32
    %c0_i32_0 = arith.constant 0 : i32
    %c0_i32_1 = arith.constant 0 : i32
    return %c0_i32, %c0_i32_0 : i32, i32
  }
  func.func @transform_2(%arg0: i32) -> (i32, i32) {
    %c0_i32 = arith.constant 0 : i32
    %c0_i32_0 = arith.constant 0 : i32
    %c0_i32_1 = arith.constant 0 : i32
    return %c0_i32, %c0_i32_0 : i32, i32
  }
  func.func @transform_3(%arg0: i32) -> (i32, i32) {
    %c0_i32 = arith.constant 0 : i32
    %c0_i32_0 = arith.constant 0 : i32
    %c0_i32_1 = arith.constant 0 : i32
    return %c0_i32, %c0_i32_0 : i32, i32
  }
  func.func @transform_4(%arg0: i32) -> (i32, i32) {
    %c0_i32 = arith.constant 0 : i32
    %c0_i32_0 = arith.constant 0 : i32
    %c0_i32_1 = arith.constant 0 : i32
    return %c0_i32, %c0_i32_0 : i32, i32
  }
  func.func @transform_5(%arg0: i32) -> (i32, i32) {
    %c0_i32 = arith.constant 0 : i32
    %c0_i32_0 = arith.constant 0 : i32
    %c0_i32_1 = arith.constant 0 : i32
    return %c0_i32, %c0_i32_0 : i32, i32
  }
  func.func @transform_6(%arg0: i32) -> (i32, i32) {
    %c0_i32 = arith.constant 0 : i32
    %c0_i32_0 = arith.constant 0 : i32
    %c0_i32_1 = arith.constant 0 : i32
    return %c0_i32, %c0_i32_0 : i32, i32
  }
  func.func @transform_7(%arg0: i32) -> (i32, i32) {
    %c0_i32 = arith.constant 0 : i32
    %c0_i32_0 = arith.constant 0 : i32
    %c0_i32_1 = arith.constant 0 : i32
    return %c0_i32, %c0_i32_0 : i32, i32
  }
  func.func @transform_8(%arg0: i32) -> (i32, i32) {
    %c0_i32 = arith.constant 0 : i32
    %c0_i32_0 = arith.constant 0 : i32
    %c0_i32_1 = arith.constant 0 : i32
    return %c0_i32, %c0_i32_0 : i32, i32
  }
  func.func @transform_9(%arg0: i32) -> (i32, i32) {
    %c0_i32 = arith.constant 0 : i32
    %c0_i32_0 = arith.constant 0 : i32
    return %c0_i32, %arg0 : i32, i32
  }
}

</mosaic_0001>

<bundles_post_ra>
// kernel: tpu_custom_call.1
= control target key start
LH: loop header
LB: loop body
LE: loop exit
PB: predicated region body
PF: predicated region fallthrough
CT: control target
= control target key end

     0   :  { %vm65_vm0 = vcmask 64512   ;;  %v540_v2 = vmov 0.0   ;;  %vm541_vm1 = vmmov 0   ;;  %v542_v6 = vmov 0   ;;  %s744_s0 = inlined_call_operand.vmem [shape: f32[128,8], index: 0, kind: input, shape index: {}]   ;;  %s745_s1 = inlined_call_operand.vmem [shape: bf16[8,8], index: 1, kind: input, shape index: {}]   ;;  %s746_s2 = inlined_call_operand.vmem [shape: f32[8,1], index: 2, kind: input, shape index: {}]   ;;  %s747_s3 = inlined_call_operand.vmem [shape: bf16[64,8], index: 3, kind: input, shape index: {}]   ;;  %s748_s4 = inlined_call_operand.vmem [shape: f32[64,1], index: 4, kind: input, shape index: {}]   ;;  %s749_s5 = inlined_call_operand.vmem [shape: bf16[8,64], index: 5, kind: input, shape index: {}]   ;;  %s750_s6 = inlined_call_operand.vmem [shape: f32[8,1], index: 6, kind: input, shape index: {}]   ;;  %s751_s7 = inlined_call_operand.vmem [shape: bf16[2,8], index: 7, kind: input, shape index: {}]   ;;  %s752_s8 = inlined_call_operand.vmem [shape: f32[2,1], index: 8, kind: input, shape index: {}]   ;;  %s753_s9 = inlined_call_operand.hbm [shape: f32[2,128], index: 9, kind: output, shape index: {}]  }
   0x1   :  { %v34_v0 = vld [vmem:[%s744_s0] sm:$0xff]  ;;  %v35_v1 = vld [vmem:[%s744_s0 + $0x8] sm:$0xff]  ;;  %457 = vmatprep.subr.bf16.mxu0 %v540_v2  ;;  %v36_v4 = vld [vmem:[%s744_s0 + $0x10] sm:$0xff]  ;;  %473 = vmatprep.mubr.msk.bf16.mxu0 %vm541_vm1, %v540_v2 }
   0x2   :  { %v50_v3 = vpack.c.bf16 %v35_v1, %v34_v0  ;;  %v37_v5 = vld [vmem:[%s744_s0 + $0x18] sm:$0xff]  ;;  %510 = vset.pattern.permute.xlu0 %v542_v6  ;;  %511 = vset.pattern.permute.xlu1 %v542_v6  ;;  %v59_v9 = vld [vmem:[%s746_s2] sm:$0xff]  ;;  %v39_v13 = vld [vmem:[%s744_s0 + $0x28] sm:$0xff] }
   0x3   :  { %v51_v8 = vpack.c.bf16 %v37_v5, %v36_v4  ;;  %62 = vperm.xlu0 %510, %v59_v9   ;;  %v143_v10 = vld [vmem:[%s748_s4] sm:$0xff] }
   0x4   :  { %v70_v7 = vsel %vm65_vm0, %v50_v3, 0  ;;  %v38_v12 = vld [vmem:[%s744_s0 + $0x20] sm:$0xff] }
   0x5   :  { %458 = vmatpush3.bf16.xpose.msra.mxu0 %v70_v7  ;;  %v73_v11 = vsel %vm65_vm0, %v51_v8, 0 }
   0x6   :  { %459 = vmatprep.subr.bf16.mxu0 %v540_v2 }
   0x7   :  { %153 = vperm.xlu0 %510, %v143_v10  }
   0x8   :  { %14 = vsyncpa [#allocation3], 0  ;;  %v146_v14 = vld [vmem:[%s748_s4 + $0x18] sm:$0xff]  ;;  %v52_v15 = vpack.c.bf16 %v39_v13, %v38_v12  ;;  %v148_v16 = vld [vmem:[%s748_s4 + $0x28] sm:$0xff]  ;;  %vm223_vm2 = vcmask 1043456   ;;  %vm311_vm3 = vcmask 523264  }
   0x9   :  { %v40_v18 = vld [vmem:[%s744_s0 + $0x30] sm:$0xff]  ;;  %v41_v19 = vld [vmem:[%s744_s0 + $0x38] sm:$0xff]  ;;  %v358_v22 = vld [vmem:[%s752_s8] sm:$0x3]  ;;  %s543_s25 = smov [#allocation2]  }
   0xa   :  { %v76_v17 = vsel %vm65_vm0, %v52_v15, 0  ;;  %v150_v20 = vld [vmem:[%s748_s4 + $0x38] sm:$0xff]  ;;  %v53_v21 = vpack.c.bf16 %v41_v19, %v40_v18  ;;  %v42_v24 = vld [vmem:[%s744_s0 + $0x40] sm:$0xff]  ;;  %v43_v25 = vld [vmem:[%s744_s0 + $0x48] sm:$0xff]  ;;  %s417_s26 = sshll.u32 %s543_s25, 4  ;;  %s418_s26 = int_to_ptr.vmem [resolvable:$true] %s417_s26 }
   0xb   :  { %168 = vperm.xlu0 %510, %v146_v14   ;;  %v54_v26 = vpack.c.bf16 %v43_v25, %v42_v24  ;;  %v44_v28 = vld [vmem:[%s744_s0 + $0x50] sm:$0xff]  ;;  %v45_v29 = vld [vmem:[%s744_s0 + $0x58] sm:$0xff]  ;;  %v46_v32 = vld [vmem:[%s744_s0 + $0x60] sm:$0xff]  ;;  %s516_s2 = scalar_lea.vmem %s418_s26, 32  ;;  %p521_p1 = scmp.lt.s32.totalorder %s418_s26, %s418_s26 }
   0xc   :  { %v79_v23 = vsel %vm65_vm0, %v53_v21, 0  ;;  %v55_v30 = vpack.c.bf16 %v45_v29, %v44_v28  ;;  %v47_v33 = vld [vmem:[%s744_s0 + $0x68] sm:$0xff]  ;;  %v48_v36 = vld [vmem:[%s744_s0 + $0x70] sm:$0xff]  ;;  %v49_v37 = vld [vmem:[%s744_s0 + $0x78] sm:$0xff]  ;;  %p517_p0 = scmp.ne.s32.totalorder %s418_s26, %s516_s2  ;;  %p522_p2 = scmp.lt.s32.totalorder %s516_s2, %s516_s2 }
   0xd   :  { %460 = vmatpush3.bf16.xpose.msra.mxu0 %v73_v11  ;;  %v82_v27 = vsel %vm65_vm0, %v54_v26, 0  ;;  %v56_v34 = vpack.c.bf16 %v47_v33, %v46_v32  ;;  %v57_v38 = vpack.c.bf16 %v49_v37, %v48_v36  ;;  %v58_v40 = vld [vmem:[%s745_s1] sm:$0xf]  ;;  %v144_v42 = vld [vmem:[%s748_s4 + $0x8] sm:$0xff]  ;;  %v145_v43 = vld [vmem:[%s748_s4 + $0x10] sm:$0xff] }
   0xe   :  { %461 = vmatprep.subr.bf16.mxu0 %v540_v2  ;;  %v85_v31 = vsel %vm65_vm0, %v55_v30, 0  ;;  %v512_v41 = vld [vmem:[%s747_s3] sm:$0xff]   ;;  %158 = vperm.xlu1 %511, %v144_v42   ;;  %v149_v45 = vld [vmem:[%s748_s4 + $0x30] sm:$0xff]  ;;  %v513_v56 = vld [vmem:[%s747_s3 + $0x8] sm:$0xff]   ;;  %p523_p3 = por %p522_p2, %p521_p1 }
   0xf   :  { %178 = vperm.xlu0 %510, %v148_v16   ;;  %v88_v35 = vsel %vm65_vm0, %v56_v34, 0  ;;  %v91_v39 = vsel %vm65_vm0, %v57_v38, 0  ;;  %479 = vmatprep.mubr.msk.bf16.mxu1 %vm65_vm0, %v512_v41  ;;  %v147_v44 = vld [vmem:[%s748_s4 + $0x20] sm:$0xff]  ;;  %v514_v57 = vld [vmem:[%s747_s3 + $0x10] sm:$0xff]   ;;  %v515_v58 = vld [vmem:[%s747_s3 + $0x18] sm:$0xff]  }
  0x10   :  { %v305_v46 = vld [vmem:[%s750_s6] sm:$0xff]  ;;  %p524_p4 = pnand %p523_p3, %p517_p0 }
  0x11   :  { %v304_v32 = vld [vmem:[%s749_s5] sm:$0xf] }
  0x12   :  { %163 = vperm.xlu1 %511, %v145_v43   ;;  %v357_v42 = vld [vmem:[%s751_s7] sm:$0x1] }
  0x13   :  { %188 = vperm.xlu0 %510, %v150_v20  }
  0x15   :  { %462 = vmatpush3.bf16.xpose.msra.mxu0 %v76_v17 }
  0x16   :  { %463 = vmatprep.subr.bf16.mxu0 %v540_v2  ;;  %173 = vperm.xlu1 %511, %v147_v44  }
  0x17   :  { %361 = vperm.xlu0 %510, %v358_v22  }
  0x1a   :  { %183 = vperm.xlu1 %511, %v149_v45  }
  0x1d   :  { %464 = vmatpush3.bf16.xpose.msra.mxu0 %v79_v23 }
  0x1e   :  { %465 = vmatprep.subr.bf16.mxu0 %v540_v2  ;;  %308 = vperm.xlu1 %511, %v305_v46  }
  0x25   :  { %466 = vmatpush3.bf16.xpose.msra.mxu0 %v82_v27 }
  0x26   :  { %467 = vmatprep.subr.bf16.mxu0 %v540_v2 }
  0x2d   :  { %468 = vmatpush3.bf16.xpose.msra.mxu0 %v85_v31 }
  0x2e   :  { %469 = vmatprep.subr.bf16.mxu0 %v540_v2 }
  0x35   :  { %470 = vmatpush3.bf16.xpose.msra.mxu0 %v88_v35 }
  0x36   :  { %471 = vmatprep.subr.bf16.mxu0 %v540_v2 }
  0x3d   :  { %472 = vmatpush3.bf16.xpose.msra.mxu0 %v91_v39 }
  0x44   :  { %474 = vmatmul.mubr.msk.bf16.vlgmr.msra.gmra.mrb[0].mxu0 %vm65_vm0, %v58_v40 }
  0x82   :  { %v63_v47 = vpop.permute.xlu0 %62 }
  0x86   :  { %v154_v60 = vpop.permute.xlu0 %153 }
  0x8a   :  { %v169_v62 = vpop.permute.xlu0 %168 }
  0x8d   :  { %v159_v59 = vpop.permute.xlu1 %158 }
  0x8e   :  { %v179_v8 = vpop.permute.xlu0 %178 }
  0x91   :  { %v164_v61 = vpop.permute.xlu1 %163 }
  0x92   :  { %v189_v20 = vpop.permute.xlu0 %188 }
  0x95   :  { %v174_v3 = vpop.permute.xlu1 %173 }
  0x99   :  { %v184_v15 = vpop.permute.xlu1 %183 }
  0x9d   :  { %v309_v33 = vpop.permute.xlu1 %308 }
 0x117   :  { %v127_v48 = vpop.f32.mrb[0].mxu0 }
 0x118   :  { %v128_v49 = vadd.f32 %v127_v48, %v63_v47  ;;  %v475_v50 = vpop.f32.mrb[1].mxu0 }
 0x119   :  { %v130_v51 = vpop.f32.mrb[2].mxu0 }
 0x11a   :  { %v133_v52 = vmax.f32 %v128_v49, 0.0  ;;  %v476_v53 = vpop.f32.mrb[3].mxu0 }
 0x11c   :  { %v134_v54 = vpack.c.bf16 %v133_v52, %v133_v52 }
 0x11e   :  { %505 = vmatprep.subr.msk.bf16.mxu1 %vm223_vm2, %v134_v54  ;;  %v225_v55 = vsel %vm223_vm2, %v134_v54, 0 }
 0x11f   :  { %478 = vmatpush3.bf16.msra.mxu1 %v225_v55 }
 0x120   :  { %487 = vmatprep.subr.bf16.mxu1 %v540_v2 }
 0x122   :  { %480 = vmatmul.mubr.msk.bf16.vlgmr.msra.gmra.mrb[0].mxu1 %vm65_vm0, %v513_v56 }
 0x123   :  { %483 = vmatprep.mubr.msk.bf16.mxu1 %vm65_vm0, %v514_v57 }
 0x12a   :  { %484 = vmatmul.mubr.msk.bf16.gmra.mrb[4].mxu1 %vm65_vm0, %v515_v58 }
 0x12b   :  { %495 = vmatprep.mubr.msk.bf16.mxu1 %vm541_vm1, %v540_v2 }
 0x1f5   :  { %v481_v63 = vpop.f32.mrb[0].mxu1 }
 0x1f6   :  { %v270_v0 = vadd.f32 %v481_v63, %v164_v61  ;;  %v261_v1 = vpop.f32.mrb[1].mxu1 }
 0x1f7   :  { %v262_v4 = vadd.f32 %v261_v1, %v154_v60  ;;  %v482_v5 = vpop.f32.mrb[2].mxu1 }
 0x1f8   :  { %v273_v6 = vadd.f32 %v482_v5, %v169_v62  ;;  %v264_v7 = vpop.f32.mrb[3].mxu1  ;;  %v294_v10 = vmax.f32 %v270_v0, 0.0 }
 0x1f9   :  { %v265_v9 = vadd.f32 %v264_v7, %v159_v59  ;;  %v292_v12 = vmax.f32 %v262_v4, 0.0 }
 0x1fa   :  { %v295_v11 = vmax.f32 %v273_v6, 0.0 }
 0x1fb   :  { %v293_v13 = vmax.f32 %v265_v9, 0.0 }
 0x1fc   :  { %v301_v14 = vpack.c.bf16 %v295_v11, %v294_v10 }
 0x1fd   :  { %v300_v16 = vpack.c.bf16 %v293_v13, %v292_v12  ;;  %v485_v17 = vpop.f32.mrb[4].mxu1 }
 0x1fe   :  { %v286_v18 = vadd.f32 %v485_v17, %v184_v15  ;;  %v277_v19 = vpop.f32.mrb[5].mxu1 }
 0x1ff   :  { %v278_v21 = vadd.f32 %v277_v19, %v174_v3  ;;  %v486_v22 = vpop.f32.mrb[6].mxu1  ;;  %488 = vmatpush3.bf16.msra.mxu1 %v300_v16 }
 0x200   :  { %v289_v23 = vadd.f32 %v486_v22, %v189_v20  ;;  %v280_v24 = vpop.f32.mrb[7].mxu1  ;;  %489 = vmatprep.subr.bf16.mxu1 %v540_v2  ;;  %v298_v26 = vmax.f32 %v286_v18, 0.0 }
 0x201   :  { %v281_v25 = vadd.f32 %v280_v24, %v179_v8  ;;  %v296_v28 = vmax.f32 %v278_v21, 0.0 }
 0x202   :  { %v299_v27 = vmax.f32 %v289_v23, 0.0 }
 0x203   :  { %v297_v29 = vmax.f32 %v281_v25, 0.0  ;;  %490 = vmatpush3.bf16.msra.mxu1 %v301_v14 }
 0x204   :  { %v303_v30 = vpack.c.bf16 %v299_v27, %v298_v26  ;;  %491 = vmatprep.subr.bf16.mxu1 %v540_v2 }
 0x205   :  { %v302_v31 = vpack.c.bf16 %v297_v29, %v296_v28 }
 0x207   :  { %492 = vmatpush3.bf16.msra.mxu1 %v302_v31 }
 0x208   :  { %493 = vmatprep.subr.bf16.mxu1 %v540_v2 }
 0x20b   :  { %494 = vmatpush3.bf16.msra.mxu1 %v303_v30 }
 0x20c   :  { %499 = vmatprep.subr.bf16.mxu1 %v540_v2 }
 0x20e   :  { %496 = vmatmul.mubr.msk.bf16.vlgmr.msra.gmra.mrb[8].mxu1 %vm311_vm3, %v304_v32 }
 0x20f   :  { %501 = vmatprep.mubr.msk.bf16.mxu1 %vm541_vm1, %v540_v2  ;;  %v362_v2 = vpop.permute.xlu0 %361 }
 0x2e1   :  { %v349_v34 = vpop.f32.mrb[8].mxu1 }
 0x2e2   :  { %v350_v35 = vadd.f32 %v349_v34, %v309_v33  ;;  %v497_v36 = vpop.f32.mrb[9].mxu1 }
 0x2e3   :  { %v352_v37 = vpop.f32.mrb[10].mxu1 }
 0x2e4   :  { %v355_v38 = vmax.f32 %v350_v35, 0.0  ;;  %v498_v39 = vpop.f32.mrb[11].mxu1 }
 0x2e6   :  { %v356_v40 = vpack.c.bf16 %v355_v38, %v355_v38 }
 0x2e8   :  { %v368_v41 = vsel %vm223_vm2, %v356_v40, 0 }
 0x2e9   :  { %500 = vmatpush3.bf16.msra.mxu1 %v368_v41 }
 0x2ec   :  { %502 = vmatmul.mubr.msk.bf16.vlgmr.msra.gmra.mrb[12].mxu1 %vm65_vm0, %v357_v42 }
 0x3bf   :  { %v404_v43 = vpop.f32.mrb[12].mxu1 }
 0x3c0   :  { %v405_v44 = vadd.f32 %v404_v43, %v362_v2  ;;  %v503_v45 = vpop.f32.mrb[13].mxu1 }
 0x3c1   :  { %v407_v46 = vpop.f32.mrb[14].mxu1 }
 0x3c2   :  { %410 = vst [vmem:[#allocation2] sm:$0x3] %v405_v44  ;;  %v504_v47 = vpop.f32.mrb[15].mxu1 }
 0x3c3   :  { %527 = shalt.err (!%p524_p4)
}
 0x3c4   :  { %s528_s28 = scalar_lea.hbm %s753_s9, 32 }
 0x3c5   :  { %p529_p5 = scmp.ne.s32.totalorder %s753_s9, %s528_s28  ;;  %p532_p6 = scmp.lt.u32.totalorder %s528_s28, %s753_s9 }
 0x3c7   :  { %p534_p7 = pnand %p532_p6, %p529_p5 }
 0x3c9   :  { %537 = shalt.err (!%p534_p7)
}
 0x3ca   :  { %420 = dma.vmem_to_hbm [thread:$0]  %s418_s26, 32, %s753_s9, [#allocation3]  }
 0x3cb   :  { %538 = dma.done.wait [#allocation3], 32  }
 0x3cc   :  { %539 = vsyncadd [#allocation3], 4294967264 }
 0x3cd   :  { %424 = vsyncpa [#allocation3], 1 }

</bundles_post_ra>
